<compile_context>
chip_gen: v7x
topology: tpu7x:2x2x1
jax: 0.10.0
libtpu: 0.0.40
codegen_flags: <defaults>
</compile_context>

<pallas_src>
import jax
import jax.numpy as jnp
from jax import lax
from jax.experimental import pallas as pl
from jax.experimental.pallas import tpu as pltpu


# ----------------------------------------------------------------------------
# Pallas kernel: fused (3x3 conv as one im2col matmul) + pos-emb/bias term
#                + ReLU + (BN-folded) 1x1 conv + Sigmoid, transposed layout.
# ----------------------------------------------------------------------------
def _attn_core_kernel(pt_ref, w3t_ref, embb_ref, w1f_ref, o_ref):
    # pt_ref   : (K, Mt)   bf16  im2col patches, K = 9*ifc, Mt = B_TILE*H*W
    # w3t_ref  : (C1, K)   bf16  3x3 conv weights (x channels) + zero ones-row
    # embb_ref : (C1, Mt)  f32   conv3x3(pos_emb)+b3 (tiled per batch) + ones row
    # w1f_ref  : (P, C1)   bf16  BN-folded 1x1 conv weights, last col = folded bias
    # o_ref    : (P, Mt)   f32   lane-dense output (batch*H*W on the lane axis)
    acc = jnp.dot(w3t_ref[...], pt_ref[...],
                  preferred_element_type=jnp.float32)           # (C1, Mt) MXU
    acc = jnp.maximum(acc + embb_ref[...], 0.0)                 # bias/emb + ReLU
    out = jnp.dot(w1f_ref[...], acc.astype(jnp.bfloat16),
                  preferred_element_type=jnp.float32)           # (P, Mt) MXU, bf16
    o_ref[...] = jax.nn.sigmoid(out).astype(o_ref.dtype)


def _im2col_kt(x_nchw):
    """(N, Cin, H, W) -> (9*Cin, N*H*W); K index = (dy*3+dx)*Cin + cin.

    Transposes to (Cin, N, H, W) first so the patches land directly in the
    (K, lane) layout the kernel consumes -- no extra transpose of the big
    patch array afterwards.
    """
    N, Cin, H, W = x_nchw.shape
    xt = jnp.transpose(x_nchw, (1, 0, 2, 3))                    # (Cin, N, H, W)
    xp = jnp.pad(xt, ((0, 0), (0, 0), (1, 1), (1, 1)))
    cols = [xp[:, :, dy:dy + H, dx:dx + W].reshape(Cin, N * H * W)
            for dy in range(3) for dx in range(3)]
    return jnp.concatenate(cols, axis=0)                        # (9*Cin, N*H*W)


def _fold_core_params(params, H, W, ifc):
    """Fold pos-emb conv, conv bias, eval-mode BN, and the 1x1 bias (ones-row
    trick) into the three kernel operands."""
    w3 = params["w3"]            # (C, ifc+SE, 3, 3)   PyTorch OIHW layout
    b3 = params["b3"]            # (C,)
    w1 = params["w1"]            # (P, C, 1, 1)
    b1 = params["b1"]            # (P,)
    pos = params["pos_emb"]      # (SE, 16, 16)
    C = w3.shape[0]
    SE = w3.shape[1] - ifc

    # Batch-invariant positional-embedding branch of the 3x3 conv (+ bias),
    # precomputed once with XLA in f32: shape (C, H*W).
    emb = pos
    if emb.shape[-2:] != (H, W):
        emb = jax.image.resize(emb, (SE, H, W), method="linear")
    embb = lax.conv_general_dilated(
        emb[None], w3[:, ifc:], (1, 1), ((1, 1), (1, 1)),
        dimension_numbers=("NCHW", "OIHW", "NCHW"))[0]
    embb = embb.reshape(C, H * W) + b3[:, None]

    # x-channel part of the 3x3 conv as (C, 9*ifc), K ordered (dy*3+dx)*ifc+cin
    # to match _im2col_kt.
    w3t = jnp.transpose(w3[:, :ifc], (0, 2, 3, 1)).reshape(C, 9 * ifc)

    # Fold eval-mode BatchNorm (sits between ReLU and the linear 1x1 conv).
    eps = 1e-5
    scale = params["bn_gamma"] / jnp.sqrt(params["bn_var"] + eps)
    shift = params["bn_beta"] - params["bn_mean"] * scale
    w1_2d = w1[:, :, 0, 0]                          # (P, C)
    w1f = w1_2d * scale[None, :]                    # (P, C)
    b1f = b1 + w1_2d @ shift                        # (P,)

    # Bias fold via a constant-ones row (review item 10):
    #   w3t row C is zero and embb row C is 1.0  ->  acc row C == 1 after ReLU,
    #   w1f column C is b1f                       ->  second dot adds the bias.
    w3t_aug = jnp.concatenate([w3t, jnp.zeros((1, w3t.shape[1]), w3t.dtype)], 0)
    embb_aug = jnp.concatenate([embb, jnp.ones((1, embb.shape[1]), embb.dtype)], 0)
    w1f_aug = jnp.concatenate([w1f, b1f[:, None]], 1)

    return dict(w3t=w3t_aug.astype(jnp.bfloat16),   # (C+1, 9*ifc)
                embb=embb_aug,                      # (C+1, H*W)  f32
                w1f=w1f_aug.astype(jnp.bfloat16))   # (P, C+1)


def core_pallas(x_nchw, folded, *, max_batch_tile=256,
                vmem_limit_bytes=48 << 20, out_dtype=jnp.float32):
    N, ifc, H, W = x_nchw.shape
    M = H * W
    K = 9 * ifc
    C1 = folded["w3t"].shape[0]          # C + 1 (ones row)
    P = folded["w1f"].shape[0]

    # ---- batch tile sizing (review items 1/2/5/6) ---------------------------
    # Per-batch VMEM footprint of one pipelined step (double-buffered):
    per_batch_vmem = (2 * K * M * 2          # bf16 patch tile
                      + 2 * C1 * M * 4       # f32 embb tile (constant index map)
                      + 2 * P * M * 4)       # f32 output tile
    b_tile = max(1, min(max_batch_tile,
                        (vmem_limit_bytes // 2) // per_batch_vmem))
    if N > 1:
        # Keep >= 2 grid steps so both v7x TensorCores get work; on v5e/v6e
        # the lost amortization from the extra split is negligible.
        b_tile = min(b_tile, pl.cdiv(N, 2))
    b_tile = min(b_tile, N)
    n_tiles = pl.cdiv(N, b_tile)
    Np = n_tiles * b_tile
    if Np != N:
        x_nchw = jnp.pad(x_nchw, ((0, Np - N), (0, 0), (0, 0), (0, 0)))

    Mt = b_tile * M
    patches = _im2col_kt(x_nchw).astype(jnp.bfloat16)      # (K, Np*M)
    embb_t = jnp.tile(folded["embb"], (1, b_tile))         # (C1, Mt), batch-invariant

    out = pl.pallas_call(
        _attn_core_kernel,
        out_shape=jax.ShapeDtypeStruct((P, Np * M), out_dtype),
        grid_spec=pltpu.PrefetchScalarGridSpec(
            num_scalar_prefetch=0,
            grid=(n_tiles,),                               # b_tile batches / step
            in_specs=[
                pl.BlockSpec((K, Mt), lambda n: (0, n)),
                pl.BlockSpec((C1, K), lambda n: (0, 0)),
                pl.BlockSpec((C1, Mt), lambda n: (0, 0)),
                pl.BlockSpec((P, C1), lambda n: (0, 0)),
            ],
            out_specs=pl.BlockSpec((P, Mt), lambda n: (0, n)),
        ),
        compiler_params=pltpu.CompilerParams(
            dimension_semantics=("parallel",),             # megacore-friendly
            vmem_limit_bytes=vmem_limit_bytes),
    )(patches, folded["w3t"], embb_t, folded["w1f"])

    # (P, Np*M) -> (N, P, H, W). The tiny P-channel transpose runs in XLA
    # outside the kernel; in-kernel stores stay lane-dense (review item 1).
    out = out.reshape(P, Np, H, W)[:, :N]
    return jnp.transpose(out, (1, 0, 2, 3))


# ----------------------------------------------------------------------------
# Glue: area interpolation + full forward
# ----------------------------------------------------------------------------
def area_interpolate(x_nchw, out_hw):
    # torch.nn.functional.interpolate(mode='area') == adaptive average pooling.
    N, C, H, W = x_nchw.shape
    oh, ow = out_hw
    if H % oh == 0 and W % ow == 0:
        fh, fw = H // oh, W // ow
        return x_nchw.reshape(N, C, oh, fh, ow, fw).mean(axis=(3, 5))
    # TODO(synk): non-integer-factor 'area' resampling not implemented (unused here).
    raise NotImplementedError("non-integer area resize factor")


def spatial_attention_forward(inputs, params, detached=False):
    x = inputs[0]
    d = inputs[-1]
    if detached:
        x = lax.stop_gradient(x)
    # Mirrors the PyTorch module, which only compares the last (width) dim.
    if x.shape[-1] != d.shape[-1]:
        x = area_interpolate(x, (d.shape[-2], d.shape[-1]))
    N, ifc, H, W = x.shape
    folded = _fold_core_params(params, H, W, ifc)
    return core_pallas(x, folded)                          # (N, n_parts, H, W)


# ----------------------------------------------------------------------------
# Deterministic parameter init (PyTorch layouts, shapes follow __init__)
# ----------------------------------------------------------------------------
def init_params(key, ifc, n_parts, se_channel):
    C = ifc + se_channel
    ks = jax.random.split(key, 9)
    w3 = 0.05 * jax.random.normal(ks[0], (C, C, 3, 3), jnp.float32)   # OIHW
    b3 = 0.05 * jax.random.normal(ks[1], (C,), jnp.float32)
    bn_gamma = 1.0 + 0.1 * jax.random.normal(ks[2], (C,), jnp.float32)
    bn_beta = 0.1 * jax.random.normal(ks[3], (C,), jnp.float32)
    bn_mean = 0.1 * jax.random.normal(ks[4], (C,), jnp.float32)
    bn_var = jnp.abs(1.0 + 0.1 * jax.random.normal(ks[5], (C,), jnp.float32))
    w1 = 0.1 * jax.random.normal(ks[6], (n_parts, C, 1, 1), jnp.float32)
    b1 = 0.1 * jax.random.normal(ks[7], (n_parts,), jnp.float32)
    # TODO(synk): source of `neko_add_embint_se(16,16,se_channel)` is unavailable;
    # approximated as a learned (se_channel,16,16) positional-embedding grid
    # concatenated on the channel axis (resized if H,W != 16).
    pos_emb = 0.1 * jax.random.normal(ks[8], (se_channel, 16, 16), jnp.float32)
    return dict(w3=w3, b3=b3, bn_gamma=bn_gamma, bn_beta=bn_beta,
                bn_mean=bn_mean, bn_var=bn_var, w1=w1, b1=b1, pos_emb=pos_emb)


# ----------------------------------------------------------------------------
# Pure-JAX reference (un-fused, f32) for correctness check
# ----------------------------------------------------------------------------
def reference_forward(x_nchw, params, ifc):
    N, _, H, W = x_nchw.shape
    pos = params["pos_emb"]
    SE = pos.shape[0]
    emb = pos
    if emb.shape[-2:] != (H, W):
        emb = jax.image.resize(emb, (SE, H, W), method="linear")
    x_cat = jnp.concatenate(
        [x_nchw, jnp.broadcast_to(emb[None], (N, SE, H, W))], axis=1)
    y = lax.conv_general_dilated(
        x_cat, params["w3"], (1, 1), ((1, 1), (1, 1)),
        dimension_numbers=("NCHW", "OIHW", "NCHW"))
    y = y + params["b3"][None, :, None, None]
    y = jnp.maximum(y, 0.0)
    scale = params["bn_gamma"] / jnp.sqrt(params["bn_var"] + 1e-5)
    shift = params["bn_beta"] - params["bn_mean"] * scale
    y = y * scale[None, :, None, None] + shift[None, :, None, None]
    z = lax.conv_general_dilated(
        y, params["w1"], (1, 1), ((0, 0), (0, 0)),
        dimension_numbers=("NCHW", "OIHW", "NCHW"))
    z = z + params["b1"][None, :, None, None]
    return jax.nn.sigmoid(z)


if __name__ == "__main__":
    key = jax.random.PRNGKey(0)
    ifc, n_parts, se_channel = 4, 4, 32
    N, H, W = 2, 16, 16

    kx, kd, kp = jax.random.split(key, 3)
    x = jax.random.normal(kx, (N, ifc, H, W), jnp.float32)   # input[0], NCHW
    d = jax.random.normal(kd, (N, ifc, H, W), jnp.float32)   # input[-1]
    params = init_params(kp, ifc, n_parts, se_channel)

    out = spatial_attention_forward((x, d), params, detached=False)
    out = jax.block_until_ready(out)
    assert out.shape == (N, n_parts, H, W), out.shape

    ref = reference_forward(x, params, ifc)
    max_err = float(jnp.max(jnp.abs(out - ref)))
    # bf16 MXU inputs (both dots) with f32 accumulation + f32 pos-emb branch:
    # estimated worst-case output error well under this tolerance.
    assert max_err < 5e-3, f"mismatch vs reference, max_err={max_err}"

    print("KERNEL_OK")
</pallas_src>

<mosaic_0001>
module attributes {stable_mosaic.version = 11 : i64} {
  func.func @_attn_core_kernel(%arg0: i32, %arg1: memref<36x256xbf16, #tpu.memory_space<vmem>>, %arg2: memref<37x36xbf16, #tpu.memory_space<vmem>>, %arg3: memref<37x256xf32, #tpu.memory_space<vmem>>, %arg4: memref<4x37xbf16, #tpu.memory_space<vmem>>, %arg5: memref<4x256xf32, #tpu.memory_space<vmem>>) attributes {dimension_semantics = [#tpu.dimension_semantics<parallel>], iteration_bounds = array<i64: 2>, scalar_prefetch = 0 : i64, scratch_operands = 0 : i64, tpu.core_type = #tpu.core_type<tc>, window_params = [{transform_indices = @transform_0, window_bounds = array<i64: 36, 256>}, {pipeline_mode = #tpu.pipeline_mode<synchronous>, transform_indices = @transform_1, window_bounds = array<i64: 37, 36>}, {pipeline_mode = #tpu.pipeline_mode<synchronous>, transform_indices = @transform_2, window_bounds = array<i64: 37, 256>}, {pipeline_mode = #tpu.pipeline_mode<synchronous>, transform_indices = @transform_3, window_bounds = array<i64: 4, 37>}, {transform_indices = @transform_4, window_bounds = array<i64: 4, 256>}]} {
    %c0 = arith.constant 0 : index
    %c0_0 = arith.constant 0 : index
    %0 = vector.load %arg2[%c0, %c0_0] : memref<37x36xbf16, #tpu.memory_space<vmem>>, vector<37x36xbf16>
    %c0_1 = arith.constant 0 : index
    %c0_2 = arith.constant 0 : index
    %1 = vector.load %arg1[%c0_1, %c0_2] : memref<36x256xbf16, #tpu.memory_space<vmem>>, vector<36x256xbf16>
    %cst = arith.constant dense<0.000000e+00> : vector<37x256xf32>
    %2 = tpu.matmul %0, %1, %cst {dimension_numbers = #tpu.dot_dimension_numbers<[1], [0], [0], [1], [0, 0, 1, 1], [], []>} : vector<37x36xbf16>, vector<36x256xbf16>, vector<37x256xf32> -> vector<37x256xf32>
    %c0_3 = arith.constant 0 : index
    %c0_4 = arith.constant 0 : index
    %3 = vector.load %arg3[%c0_3, %c0_4] : memref<37x256xf32, #tpu.memory_space<vmem>>, vector<37x256xf32>
    %4 = arith.addf %2, %3 : vector<37x256xf32>
    %cst_5 = arith.constant 0.000000e+00 : f32
    %5 = vector.broadcast %cst_5 : f32 to vector<37x256xf32>
    %6 = arith.maximumf %4, %5 : vector<37x256xf32>
    %c0_6 = arith.constant 0 : index
    %c0_7 = arith.constant 0 : index
    %7 = vector.load %arg4[%c0_6, %c0_7] : memref<4x37xbf16, #tpu.memory_space<vmem>>, vector<4x37xbf16>
    %8 = arith.truncf %6 : vector<37x256xf32> to vector<37x256xbf16>
    %cst_8 = arith.constant dense<0.000000e+00> : vector<4x256xf32>
    %9 = tpu.matmul %7, %8, %cst_8 {dimension_numbers = #tpu.dot_dimension_numbers<[1], [0], [0], [1], [0, 0, 1, 1], [], []>} : vector<4x37xbf16>, vector<37x256xbf16>, vector<4x256xf32> -> vector<4x256xf32>
    %10 = arith.negf %9 : vector<4x256xf32>
    %11 = math.exp %10 : vector<4x256xf32>
    %cst_9 = arith.constant 1.000000e+00 : f32
    %12 = vector.broadcast %cst_9 : f32 to vector<4x256xf32>
    %13 = arith.addf %12, %11 : vector<4x256xf32>
    %14 = arith.divf %12, %13 : vector<4x256xf32>
    %c0_10 = arith.constant 0 : index
    %c0_11 = arith.constant 0 : index
    %15 = vector.load %arg5[%c0_10, %c0_11] : memref<4x256xf32, #tpu.memory_space<vmem>>, vector<4x256xf32>
    tpu.vector_store %arg5[%c0_10, %c0_11], %14 {strides = array<i32>} : memref<4x256xf32, #tpu.memory_space<vmem>>, vector<4x256xf32>,
    return
  }
  func.func @transform_0(%arg0: i32) -> (i32, i32) {
    %c0_i32 = arith.constant 0 : i32
    %c0_i32_0 = arith.constant 0 : i32
    return %c0_i32, %arg0 : i32, i32
  }
  func.func @transform_1(%arg0: i32) -> (i32, i32) {
    %c0_i32 = arith.constant 0 : i32
    %c0_i32_0 = arith.constant 0 : i32
    %c0_i32_1 = arith.constant 0 : i32
    return %c0_i32, %c0_i32_0 : i32, i32
  }
  func.func @transform_2(%arg0: i32) -> (i32, i32) {
    %c0_i32 = arith.constant 0 : i32
    %c0_i32_0 = arith.constant 0 : i32
    %c0_i32_1 = arith.constant 0 : i32
    return %c0_i32, %c0_i32_0 : i32, i32
  }
  func.func @transform_3(%arg0: i32) -> (i32, i32) {
    %c0_i32 = arith.constant 0 : i32
    %c0_i32_0 = arith.constant 0 : i32
    %c0_i32_1 = arith.constant 0 : i32
    return %c0_i32, %c0_i32_0 : i32, i32
  }
  func.func @transform_4(%arg0: i32) -> (i32, i32) {
    %c0_i32 = arith.constant 0 : i32
    %c0_i32_0 = arith.constant 0 : i32
    return %c0_i32, %arg0 : i32, i32
  }
}

</mosaic_0001>

<bundles_post_ra>
// kernel: tpu_custom_call.1
= control target key start
LH: loop header
LB: loop body
LE: loop exit
PB: predicated region body
PF: predicated region fallthrough
CT: control target
= control target key end

     0   :  { %s1135_s0 = inlined_call_operand.hbm [shape: bf16[36,512], index: 0, kind: input, shape index: {}]   ;;  %s1136_s1 = inlined_call_operand.hbm [shape: bf16[37,36], index: 1, kind: input, shape index: {}]   ;;  %s1137_s2 = inlined_call_operand.hbm [shape: f32[37,256], index: 2, kind: input, shape index: {}]   ;;  %s1138_s3 = inlined_call_operand.vmem [shape: bf16[4,37], index: 3, kind: input, shape index: {}]   ;;  %s1139_s4 = inlined_call_operand.hbm [shape: f32[4,512], index: 4, kind: output, shape index: {}]  }
   0x1   :  { %1145 = sst [smem:[#allocation12_spill]] %s1136_s1 }
   0x2   :  { %9 = vsyncpa [#allocation3], 0 }
   0x3   :  { %11 = vsyncpa [#allocation3 + $0x1], 0 }
   0x4   :  { %12 = vsyncpa [#allocation6], 0 }
   0x5   :  { %13 = vsyncpa [#allocation4], 0 }
   0x6   :  { %15 = vsyncpa [#allocation4 + $0x1], 0  ;;  %s901_s15 = smov 0   ;;  %s903_s16 = smov 0  }
   0x7   :  { %s905_s17 = smov 0   ;;  %s907_s18 = smov 0  }
   0x8 LB: > { %s922_s19 = sadd.s32 4294967295, %s862_s18   ;;  %s576_s20 = sadd.s32 4294967294, %s862_s18   ;;  %s862_s18 = sphi %s907_s18, %s1167_s18   ;;  %s858_s17 = sphi %s905_s17, %s1166_s17   ;;  %s854_s16 = sphi %s903_s16, %s1165_s16   ;;  %s850_s15 = sphi %s901_s15, %s1164_s15  }
   0x9   : > { %s926_s21 = sadd.s32 1, %s862_s18   ;;  %s28_s22 = sadd.s32 1, %s858_s17 }
   0xa   : > { %s25_s23 = ssub.s32 %s862_s18, %s926_s21  ;;  %p35_p0 = scmp.ne.s32.totalorder %s858_s17, %s854_s16 }
   0xb   : > { %p26_p1 = scmp.eq.s32.totalorder %s25_s23, 0  ;;  %p36_p2 = scmp.eq.s32.totalorder %s862_s18, 0 }
   0xc   : > { %p41_p3 = scmp.ne.s32.totalorder %s854_s16, %s850_s15  ;;  %p1140_p4 = scmp.eq.s32.totalorder %s922_s19, 0 }
   0xd   : > { %s938_s24 = scalar_select %p26_p1, %s858_s17, %s28_s22  }
   0xe   : > { %p940_p5 = por %p36_p2, %p35_p0  ;;  %p946_p6 = por %p1140_p4, %p41_p3 }
   0xf   : > { %p128_p7 = scmp.eq.s32.totalorder %s922_s19, 1  ;;  %p134_p8 = scmp.eq.s32.totalorder %s576_s20, 1 }
  0x10   : > { %s1146_s25 = scalar_select %p940_p5, 1, 0 }
  0x11   : > { %s1147_s26 = scalar_select %p946_p6, 1, 0 }
  0x12   : > { %p577_p9 = scmp.ge.s32.totalorder %s862_s18, 1  ;;  %p141_p10 = scmp.lt.s32.totalorder %s862_s18, 3 }
  0x13   : > { %p953_p11 = por %p128_p7, %p35_p0  ;;  %p957_p12 = por %p134_p8, %p41_p3 }
  0x14   : > { %p961_p13 = pnand %p577_p9, %p141_p10  ;;  %s864_s30 = smov [#allocation5]  }
  0x15   : > { %s1148_s27 = scalar_select %p953_p11, 1, 0 }
  0x16   : > { %s1149_s28 = scalar_select %p957_p12, 1, 0 }
  0x17   : > { %s1150_s29 = scalar_select %p961_p13, 1, 0 }
  0x18   : > { %p624_p1 = pneg %p961_p13  ;;  %s153_s5 = sshll.u32 %s864_s30, 4  ;;  %s154_s5 = int_to_ptr.vmem [resolvable:$true] %s153_s5 }
  0x19   : > { %s865_s7 = smov [#allocation7]   ;;  %s1152_s1 = sld [smem:[#allocation12_spill]] }
  0x1a   : > { %p969_p2 = pnand %p624_p1, %p1140_p4  ;;  %s166_s8 = sshll.u32 %s865_s7, 4  ;;  %s167_s8 = int_to_ptr.vmem [resolvable:$true] %s166_s8 }
  0x1c   : > { %p708_p8 = pneg %p969_p2 }
  0x1f   : > { %s706_s11 = scalar_lea.hbm %s1152_s1, 320 }
  0x20   : > { %p707_p7 = scmp.ne.s32.totalorder %s1152_s1, %s706_s11  ;;  %p713_p1 = scmp.lt.u32.totalorder %s706_s11, %s1152_s1 }
  0x22   : > { %p709_p9 = pnand %p708_p8, %p707_p7 }
  0x24   : > { %p710_p10 = pneg %p709_p9 }
  0x26   : > { %p715_p0 = pnand %p713_p1, %p710_p10 }
  0x28   : > { %718 = shalt.err (!%p715_p0)
}
  0x29   : > { %s719_s22 = scalar_lea.vmem %s154_s5, 320  ;;  %p727_p11 = scmp.lt.s32.totalorder %s154_s5, %s154_s5 }
  0x2a   : > { %p720_p4 = scmp.ne.s32.totalorder %s154_s5, %s719_s22  ;;  %p728_p6 = scmp.lt.s32.totalorder %s719_s22, %s719_s22 }
  0x2c   : > { %p722_p3 = pnand %p720_p4, %p708_p8  ;;  %p729_p13 = por %p728_p6, %p727_p11 }
  0x2e   : > { %p723_p12 = pneg %p722_p3 }
  0x30   : > { %p730_p5 = pnand %p729_p13, %p723_p12 }
  0x32   : > { %733 = shalt.err (!%p730_p5)
}
  0x33   : > { %s866_s23 = smov 64   ;;  %s867_s30 = smov 4  }
  0x34   : > { %627 = dma.hbm_to_vmem [thread:$0]  (!%p969_p2), %s1152_s1, 320, %s154_s5, [#allocation6], %s866_s23, %s866_s23, %s867_s30  }
  0x35   : > { %p1153_p0 = scmp.ne.s32.totalorder %s1146_s25, 0  ;;  %p1154_p4 = scmp.lt.s32.totalorder %s862_s18, 2 }
  0x36   : > { %s183_s11 = sand.u32 1, %s858_s17   ;;  %s734_s14 = scalar_lea.hbm %s1137_s2, 1280 }
  0x37   : > { %p1001_p3 = pnand %p1154_p4, %p1153_p0  ;;  %p735_p5 = scmp.ne.s32.totalorder %s1137_s2, %s734_s14 }
  0x38   : > { %p741_p12 = scmp.lt.u32.totalorder %s734_s14, %s1137_s2 }
  0x39   : > { %s1155_s10 = scalar_select %p1001_p3, 1, 0 }
  0x3a   : > { %p737_p6 = pnand %p735_p5, %p708_p8 }
  0x3c   : > { %p738_p11 = pneg %p737_p6 }
  0x3e   : > { %p743_p13 = pnand %p741_p12, %p738_p11 }
  0x40   : > { %746 = shalt.err (!%p743_p13)
}
  0x41   : > { %s747_s23 = scalar_lea.vmem %s167_s8, 1280  ;;  %p755_p1 = scmp.lt.s32.totalorder %s167_s8, %s167_s8 }
  0x42   : > { %p748_p7 = scmp.ne.s32.totalorder %s167_s8, %s747_s23  ;;  %p756_p0 = scmp.lt.s32.totalorder %s747_s23, %s747_s23 }
  0x44   : > { %p750_p9 = pnand %p748_p7, %p708_p8  ;;  %p757_p4 = por %p756_p0, %p755_p1 }
  0x46   : > { %p751_p10 = pneg %p750_p9 }
  0x48   : > { %p758_p3 = pnand %p757_p4, %p751_p10 }
  0x4a   : > { %761 = shalt.err (!%p758_p3)
}
  0x4b   : > { %s868_s30 = smov 256   ;;  %s869_s7 = smov 16  }
  0x4c   : > { %630 = dma.hbm_to_vmem [thread:$0]  (!%p969_p2), %s1137_s2, 1280, %s167_s8, [#allocation6], %s868_s30, %s868_s30, %s869_s7  }
  0x4d   : > { %s610_s13 = smul.u32 40, %s183_s11  ;;  %s608_s14 = sshll.u32 %s862_s18, 7 }
  0x4e   : > { %s1032_s25 = scalar_lea.hbm %s1135_s0, %s608_s14  ;;  %s1036_s6 = scalar_lea.sflag [#allocation3], %s183_s11 }
  0x4f   : > { %s187_s5 = scalar_lea.vmem [#allocation2], %s610_s13  ;;  %s762_s1 = scalar_lea.hbm %s1032_s25, 640 }
  0x50   : > { %s194_s23 = sshll.u32 %s187_s5, 4  ;;  %p763_p8 = scmp.ne.s32.totalorder %s1032_s25, %s762_s1  ;;  %s1034_s23 = int_to_ptr.vmem [resolvable:$true] %s194_s23 }
  0x51   : > { %p1156_p2 = scmp.ne.s32.totalorder %s1155_s10, 0  ;;  %s767_s9 = scalar_lea.hbm %s1135_s0, 1280 }
  0x52   : > { %p768_p11 = scmp.lt.u32.totalorder %s1032_s25, %s1135_s0  ;;  %p769_p12 = scmp.lt.u32.totalorder %s767_s9, %s762_s1 }
  0x53   : > { %p764_p3 = pneg %p1156_p2  ;;  %p771_p7 = scmp.lt.u32.totalorder %s762_s1, %s1032_s25 }
  0x54   : > { %p770_p13 = por %p769_p12, %p768_p11 }
  0x55   : > { %p765_p5 = pnand %p764_p3, %p763_p8 }
  0x56   : > { %p772_p9 = por %p771_p7, %p770_p13 }
  0x57   : > { %p766_p6 = pneg %p765_p5 }
  0x59   : > { %p773_p10 = pnand %p772_p9, %p766_p6 }
  0x5b   : > { %776 = shalt.err (!%p773_p10)
}
  0x5c   : > { %s777_s11 = scalar_lea.vmem %s1034_s23, 640  ;;  %s870_s13 = smov [#allocation2]  }
  0x5d   : > { %p778_p1 = scmp.ne.s32.totalorder %s1034_s23, %s777_s11  ;;  %s782_s20 = sshll.u32 %s870_s13, 4  ;;  %s783_s20 = int_to_ptr.vmem [resolvable:$false] %s782_s20 }
  0x5e   : > { %s784_s22 = scalar_lea.vmem %s783_s20, 1280  ;;  %p785_p8 = scmp.lt.s32.totalorder %s1034_s23, %s783_s20 }
  0x5f   : > { %p780_p0 = pnand %p778_p1, %p764_p3  ;;  %p786_p5 = scmp.lt.s32.totalorder %s784_s22, %s777_s11 }
  0x61   : > { %p781_p4 = pneg %p780_p0  ;;  %p787_p11 = por %p786_p5, %p785_p8 }
  0x63   : > { %p788_p12 = pnand %p787_p11, %p781_p4 }
  0x65   : > { %791 = shalt.err (!%p788_p12)
}
  0x66   : > { %s871_s1 = smov 128   ;;  %s872_s5 = smov 8  }
  0x67   : > { %634 = dma.hbm_to_vmem [thread:$0]  (!%p1156_p2), %s1032_s25, 640, %s1034_s23, %s1036_s6, %s868_s30, %s871_s1, %s872_s5  }
  0x68   : > { %p1157_p3 = scmp.ne.s32.totalorder %s1150_s29, 0 }
  0x69   : > { %s1068_s8 = sand.u32 (!%p1157_p3), 1, %s854_s16   ;;  %p1158_p6 = scmp.ne.s32.totalorder (!%p1157_p3), %s1147_s26, 0 }
  0x6a   : > { %206 = sbr.rel (%p1157_p3) target bundleno = 627 (0x273), region = 36  ;;  %s209_s9 = scalar_lea.sflag (!%p1157_p3), [#allocation3], %s1068_s8 }
  0x6b   : > { %s611_s7 = smul.u32 (!%p1157_p3), 40, %s1068_s8 }
  0x6d   : > { %s212_s12 = scalar_lea.vmem (!%p1157_p3), [#allocation2], %s611_s7 }
  0x71   : > { %837 = dma.done.wait (%p1158_p6), %s209_s9, 640  }
  0x72   : > { %839 = vsyncadd (%p1158_p6), %s209_s9, 4294966656  ;;  %p1159_p13 = scmp.eq.s32.totalorder %s922_s19, 0 }
  0x74   : > { %841 = dma.done.wait (%p1159_p13), [#allocation6], 1600   ;;  %p1160_p2 = pmov %p1159_p13 }
  0x75   : > { %v873_v0 = vmov 0   ;;  %v687_v1 = vld [vmem:[%s212_s12 + $0x4] ss:$8 sps:$4 sm:$0xff]   ;;  %v689_v2 = vld [vmem:[%s212_s12] ss:$8 sps:$4 sm:$0xff]   ;;  %vm316_vm0 = vcmask 1041408  }
  0x76   : > { %843 = vsyncadd (%p1160_p2), [#allocation6], 4294965696  ;;  %355 = vmatprep.mubr.bf16.mxu0 %v873_v0  ;;  %446 = vmatprep.mubr.bf16.mxu1 %v873_v0  ;;  %v690_v3 = vld [vmem:[%s212_s12 + $0x14] ss:$8 sps:$4 sm:$0xff]   ;;  %v257_v4 = vld [vmem:[%s212_s12 + $0x20] sm:$0x33] }
  0x77   : > { %323 = vmatprep.subr.bf16.mxu0 %v687_v1  ;;  %v692_v5 = vld [vmem:[%s212_s12 + $0x10] ss:$8 sps:$4 sm:$0xff]   ;;  %v595_v6 = vcombine.high %v257_v4, %v257_v4  ;;  %v594_v7 = vcombine.low %v257_v4, %v257_v4  ;;  %vm306_vm1 = vcmask 293888   ;;  %v258_v12 = vld [vmem:[#allocation7] sm:$0xff]  ;;  %vm405_vm2 = vcmask 1042432   ;;  %s586_s10 = sshll.u32 %s1068_s8, 3 }
  0x78   : > { %324 = vmatpush1.bf16.msra.mxu0 %v689_v2  ;;  %v695_v9 = vld [vmem:[#allocation5] sm:$0xff]   ;;  %v696_v10 = vld [vmem:[#allocation5 + $0x8] sm:$0xff]   ;;  %v697_v11 = vld [vmem:[#allocation5 + $0x10] ss:$0 sps:$4 sm:$0x77]   ;;  %v874_v53 = vmov 65535  }
  0x79   : > { %325 = vmatprep.subr.bf16.mxu0 %v690_v3  ;;  %v318_v8 = vsel %vm316_vm0, %v594_v7, 0  ;;  %v259_v13 = vld [vmem:[#allocation7 + $0x8] sm:$0xff]  ;;  %v260_v15 = vld [vmem:[#allocation7 + $0x10] sm:$0xff]  ;;  %v261_v18 = vld [vmem:[#allocation7 + $0x18] sm:$0xff]  ;;  %v406_v54 = vsel %vm316_vm0, 4294967295, %v874_v53  ;;  %vm401_vm3 = vcmask 302080  }
  0x7a   : > { %v262_v28 = vld [vmem:[#allocation7 + $0x20] sm:$0xff]  ;;  %v263_v29 = vld [vmem:[#allocation7 + $0x28] sm:$0xff]  ;;  %v264_v32 = vld [vmem:[#allocation7 + $0x30] sm:$0xff]  ;;  %v407_v61 = vsel %vm405_vm2, %v406_v54, 0  ;;  %s609_s30 = sshll.u32 %s922_s19, 7  ;;  %s244_s25 = scalar_lea.vmem [#allocation8], %s586_s10 }
  0x7b   : > { %v265_v36 = vld [vmem:[#allocation7 + $0x38] sm:$0xff]  ;;  %v266_v46 = vld [vmem:[#allocation7 + $0x40] sm:$0x1f]  ;;  %v267_v48 = vld [vmem:[#allocation7 + $0x48] sm:$0x1f]  ;;  %s487_s23 = sshll.u32 %s244_s25, 4  ;;  %s1091_s11 = scalar_lea.hbm %s1139_s4, %s609_s30  ;;  %s1093_s23 = int_to_ptr.vmem [resolvable:$true] %s487_s23 }
  0x7c   : > { %326 = vmatpush1.bf16.msra.mxu0 %v692_v5  ;;  %v394_v1 = vld [vmem:[%s1138_s3] sm:$0x3]  ;;  %s473_s13 = scalar_lea.sflag [#allocation4], %s1068_s8  ;;  %s792_s20 = scalar_lea.vmem %s1093_s23, 128 }
  0x7d   : > { %596 = vmatprep.subr.msk.bf16.mxu0 %vm316_vm0, %v595_v6  ;;  %p793_p7 = scmp.ne.s32.totalorder %s1093_s23, %s792_s20  ;;  %p1161_p9 = scmp.ne.s32.totalorder %s1148_s27, 0 }
  0x7e   : > { %s875_s19 = smov [#allocation8]  }
  0x7f   : > { %p794_p10 = pnand %p793_p7, %p1161_p9  ;;  %s796_s22 = sshll.u32 %s875_s19, 4  ;;  %s797_s22 = int_to_ptr.vmem [resolvable:$false] %s796_s22 }
  0x80   : > { %328 = vmatpush1.bf16.msra.mxu0 %v318_v8  ;;  %s798_s1 = scalar_lea.vmem %s797_s22, 256  ;;  %p799_p0 = scmp.lt.s32.totalorder %s1093_s23, %s797_s22 }
  0x81   : > { %p795_p1 = pneg %p794_p10  ;;  %p800_p4 = scmp.lt.s32.totalorder %s798_s1, %s792_s20 }
  0x83   : > { %597 = vmatmul.mubr.msk.bf16.vlgmr.msra.gmra.mrb[0].mxu0 %vm306_vm1, %v695_v9  ;;  %p801_p8 = por %p800_p4, %p799_p0 }
  0x84   : > { %365 = vmatprep.mubr.bf16.mxu0 %v873_v0 }
  0x85   : > { %p802_p5 = pnand %p801_p8, %p795_p1 }
  0x8b   : > { %598 = vmatmul.mubr.msk.bf16.gmra.mrb[4].mxu0 %vm306_vm1, %v696_v10 }
  0x8c   : > { %375 = vmatprep.mubr.bf16.mxu0 %v873_v0 }
  0x93   : > { %599 = vmatmul.mubr.msk.bf16.gmra.mrb[8].mxu0 %vm306_vm1, %v697_v11 }
 0x156   : > { %v357_v14 = vpop.f32.mrb[0].mxu0 }
 0x157   : > { %v358_v16 = vadd.f32 %v357_v14, %v258_v12  ;;  %v359_v17 = vpop.f32.mrb[1].mxu0 }
 0x158   : > { %v360_v19 = vadd.f32 %v359_v17, %v259_v13  ;;  %v361_v20 = vpop.f32.mrb[2].mxu0 }
 0x159   : > { %v362_v21 = vadd.f32 %v361_v20, %v260_v15  ;;  %v363_v22 = vpop.f32.mrb[3].mxu0  ;;  %v384_v24 = vmax.f32 %v358_v16, 0.0 }
 0x15a   : > { %v364_v23 = vadd.f32 %v363_v22, %v261_v18  ;;  %v385_v26 = vmax.f32 %v360_v19, 0.0 }
 0x15b   : > { %v386_v25 = vmax.f32 %v362_v21, 0.0 }
 0x15c   : > { %v387_v27 = vmax.f32 %v364_v23, 0.0 }
 0x15d   : > { %v395_v30 = vpack.c.bf16 %v386_v25, %v384_v24 }
 0x15e   : > { %v367_v31 = vpop.f32.mrb[4].mxu0  ;;  %v396_v33 = vpack.c.bf16 %v387_v27, %v385_v26 }
 0x15f   : > { %v368_v34 = vadd.f32 %v367_v31, %v262_v28  ;;  %v369_v35 = vpop.f32.mrb[5].mxu0 }
 0x160   : > { %v370_v37 = vadd.f32 %v369_v35, %v263_v29  ;;  %v371_v38 = vpop.f32.mrb[6].mxu0  ;;  %414 = vmatprep.subr.bf16.mxu1 %v396_v33 }
 0x161   : > { %v372_v39 = vadd.f32 %v371_v38, %v264_v32  ;;  %v373_v40 = vpop.f32.mrb[7].mxu0  ;;  %415 = vmatpush1.bf16.msra.mxu1 %v395_v30  ;;  %v388_v42 = vmax.f32 %v368_v34, 0.0 }
 0x162   : > { %v374_v41 = vadd.f32 %v373_v40, %v265_v36  ;;  %v389_v44 = vmax.f32 %v370_v37, 0.0 }
 0x163   : > { %v390_v43 = vmax.f32 %v372_v39, 0.0 }
 0x164   : > { %v391_v45 = vmax.f32 %v374_v41, 0.0 }
 0x165   : > { %v397_v47 = vpack.c.bf16 %v390_v43, %v388_v42 }
 0x166   : > { %v398_v49 = vpack.c.bf16 %v391_v45, %v389_v44  ;;  %v377_v50 = vpop.f32.mrb[8].mxu0 }
 0x167   : > { %v378_v51 = vadd.f32 %v377_v50, %v266_v46  ;;  %v379_v52 = vpop.f32.mrb[9].mxu0 }
 0x168   : > { %v380_v55 = vadd.f32 %v379_v52, %v267_v48  ;;  %v381_v56 = vpop.f32.mrb[10].mxu0  ;;  %416 = vmatprep.subr.bf16.mxu1 %v398_v49 }
 0x169   : > { %v392_v57 = vmax.f32 %v378_v51, 0.0  ;;  %v382_v58 = vpop.f32.mrb[11].mxu0  ;;  %417 = vmatpush1.bf16.msra.mxu1 %v397_v47 }
 0x16a   : > { %v393_v59 = vmax.f32 %v380_v55, 0.0 }
 0x16b   : > { %v399_v60 = vpack.c.bf16 %v392_v57, %v392_v57 }
 0x16c   : > { %v400_v62 = vpack.c.bf16 %v393_v59, %v393_v59 }
 0x16d   : > { %v409_v0 = vand.u32 %v407_v61, %v399_v60 }
 0x16e   : > { %v412_v63 = vand.u32 %v407_v61, %v400_v62 }
 0x170   : > { %418 = vmatprep.subr.bf16.mxu1 %v412_v63 }
 0x171   : > { %419 = vmatpush1.bf16.msra.mxu1 %v409_v0 }
 0x174   : > { %600 = vmatmul.mubr.msk.bf16.vlgmr.msra.gmra.mrb[0].mxu1 %vm401_vm3, %v394_v1 }
 0x247   : > { %v448_v2 = vpop.f32.mrb[0].mxu1 }
 0x248   : > { %v601_v3 = vmul.f32 -1.442695, %v448_v2  ;;  %v450_v4 = vpop.f32.mrb[1].mxu1 }
 0x249   : > { %v602_v5 = vmul.f32 -1.442695, %v450_v4  ;;  %v452_v6 = vpop.f32.mrb[2].mxu1 }
 0x24a   : > { %698 = vpow2.f32 %v601_v3  ;;  %v453_v7 = vpop.f32.mrb[3].mxu1 }
 0x24b   : > { %700 = vpow2.f32 %v602_v5 }
 0x254   : > { %v699_v8 = vpop.eup %698 }
 0x255   : > { %v701_v9 = vpop.eup %700  ;;  %v461_v10 = vadd.f32 1.0, %v699_v8 }
 0x256   : > { %v462_v11 = vadd.f32 1.0, %v701_v9 }
 0x257   : > { %702 = vrcp.f32 %v461_v10 }
 0x258   : > { %704 = vrcp.f32 %v462_v11 }
 0x261   : > { %v703_v12 = vpop.eup %702 }
 0x262   : > { %v705_v13 = vpop.eup %704 }
 0x263   : > { %v469_v14 = vcombine.low %v703_v12, %v705_v13 }
 0x265   : > { %471 = vst [vmem:[%s244_s25] sm:$0xff] %v469_v14 }
 0x266   : > { %805 = shalt.err (!%p802_p5)
}
 0x267   : > { %s806_s5 = scalar_lea.hbm %s1091_s11, 128  ;;  %s810_s9 = scalar_lea.hbm %s1139_s4, 256 }
 0x268   : > { %p807_p11 = scmp.ne.s32.totalorder %s1091_s11, %s806_s5  ;;  %p811_p6 = scmp.lt.u32.totalorder %s1091_s11, %s1139_s4 }
 0x269   : > { %p812_p13 = scmp.lt.u32.totalorder %s810_s9, %s806_s5  ;;  %p814_p7 = scmp.lt.u32.totalorder %s806_s5, %s1091_s11 }
 0x26a   : > { %p808_p12 = pnand %p807_p11, %p1161_p9 }
 0x26b   : > { %p813_p2 = por %p812_p13, %p811_p6 }
 0x26c   : > { %p809_p3 = pneg %p808_p12 }
 0x26d   : > { %p815_p10 = por %p814_p7, %p813_p2 }
 0x26f   : > { %p816_p1 = pnand %p815_p10, %p809_p3 }
 0x271   : > { %819 = shalt.err (!%p816_p1)
}
 0x272   : > { %622 = dma.vmem_to_hbm [thread:$0]  (%p1161_p9), %s1093_s23, 128, %s1091_s11, %s473_s13  }
 0x273 PF: > { %s499_s29 = sand.u32 1, %s850_s15   ;;  %p1162_p0 = scmp.ne.s32.totalorder %s1149_s28, 0 }
 0x274   : > { %p1163_p4 = scmp.ge.s32.totalorder %s862_s18, 2  ;;  %s500_s10 = scalar_lea.sflag [#allocation4], %s499_s29 }
 0x276   : > { %p636_p8 = pnand %p1163_p4, %p1162_p0 }
 0x278   : > { %845 = dma.done.wait (!%p636_p8), %s500_s10, 128  }
 0x279   : > { %847 = vsyncadd (!%p636_p8), %s500_s10, 4294967168  ;;  %p18_p5 = scmp.ge.s32.totalorder %s926_s21, 4   ;;  %s1164_s15 = smov %s854_s16 }
 0x27a   : > { %s1165_s16 = smov %s858_s17  ;;  %s1166_s17 = smov %s938_s24 }
 0x27b   : > { %s1167_s18 = smov %s926_s21  ;;  %20 = sbr.rel (!%p18_p5) target bundleno = 8 (0x8), region = 89 }
 0x282   :  { %505 = vsyncpa [#allocation3], 1 }
 0x283   :  { %507 = vsyncpa [#allocation3 + $0x1], 1 }
 0x284   :  { %508 = vsyncpa [#allocation6], 1 }
 0x285   :  { %509 = vsyncpa [#allocation4], 1 }
 0x286   :  { %511 = vsyncpa [#allocation4 + $0x1], 1 }

</bundles_post_ra>
